<compile_context>
chip_gen: v6e
topology: v6e:2x2x1
jax: 0.10.0
libtpu: 0.0.40
codegen_flags: <defaults>
</compile_context>

<pallas_src>
import functools

import jax
import jax.numpy as jnp
from jax import lax
from jax.experimental import pallas as pl
from jax.experimental.pallas import tpu as pltpu

_LANE = 128  # TPU lane width; also a multiple of every sub-32-bit packing granule.


def _vmem_capacity_bytes():
    """Physical per-core VMEM, with a conservative fallback (v7x = 64 MiB)."""
    try:
        info = pltpu.get_tpu_info()
        cap = int(getattr(info, "vmem_capacity_bytes", 0))
        if cap > 0:
            return cap
    except Exception:
        pass
    return 64 * 1024 * 1024


def _ce_per_row_kernel(logits_ref, targets_ref, loss_ref, *, total_rows, block_rows):
    """Per-sample negative log-likelihood for one batch tile.

    logits_ref : (TB, C) native-dtype VMEM (bf16 stays bf16 until needed)
    targets_ref: (1, TB) int32 VMEM (lane-dense)
    loss_ref   : (1, TB) f32 VMEM (lane-dense; rows past the real batch -> 0)
    """
    i = pl.program_id(0)

    x = logits_ref[...]                                               # (TB, C) native

    # Row max in the native dtype (exact for bf16/f32; 2x VPU width for bf16).
    row_max = jnp.max(x, axis=-1, keepdims=True).astype(jnp.float32)  # (TB, 1)

    # Single f32 traversal: `shifted` feeds both the exp-sum and the gather.
    shifted = x.astype(jnp.float32) - row_max                         # (TB, C) f32
    # exp + accumulation kept in f32 (per review correctness note).
    sum_exp = jnp.sum(jnp.exp(shifted), axis=-1, keepdims=True)       # (TB, 1)

    # Fused target gather (one-hot compare/select on `shifted`); row_max cancels:
    #   nll = (row_max + log(sum_exp)) - (shifted[t] + row_max)
    #       = log(sum_exp) - shifted[t]
    tgt_col = jnp.transpose(targets_ref[...])                         # (TB, 1) int32
    class_ids = lax.broadcasted_iota(jnp.int32, shifted.shape, 1)     # (TB, C)
    tgt_shifted = jnp.sum(jnp.where(class_ids == tgt_col, shifted, 0.0),
                          axis=-1, keepdims=True)                     # (TB, 1)

    per_sample = jnp.log(sum_exp) - tgt_shifted                       # (TB, 1)

    # Zero rows past the true batch (last partial tile holds unspecified data).
    # Select (not multiply-by-mask) so NaN/Inf from garbage rows never propagates.
    row_ids = i * block_rows + lax.broadcasted_iota(jnp.int32, per_sample.shape, 0)
    per_sample = jnp.where(row_ids < total_rows, per_sample, 0.0)

    # Lane-dense store: (TB, 1) -> (1, TB) so the writeback is a full-lane vst.
    loss_ref[...] = jnp.transpose(per_sample)


def cross_entropy_loss(logits, targets, loss_weight=1.0, *, block_rows=None):
    """logits: (B, C) float; targets: (B,) int -> scalar f32 loss."""
    B, C = logits.shape
    itemsize = jnp.dtype(logits.dtype).itemsize

    # Per-generation VMEM budget: ~40% of physical VMEM for the pipeline, and a
    # scoped-VMEM limit well above the 16/32 MiB defaults but safely under
    # v7x's 64 MiB physical VMEM (128 MiB on v5e/v6e).
    vmem_cap = _vmem_capacity_bytes()
    pipeline_budget = int(0.40 * vmem_cap)
    vmem_limit = max(min(int(0.5 * vmem_cap) + (16 << 20), vmem_cap - (8 << 20)),
                     16 << 20)

    if block_rows is None:
        # Double-buffered native-dtype logits blocks (2*itemsize), the f32
        # shifted/exp working set (~12 B/element), plus the lane-dense
        # targets/loss double buffers (~16 B/row).
        bytes_per_row = C * (2 * itemsize + 12) + 16
        block_rows = max(pipeline_budget // bytes_per_row, 1)

    if B <= _LANE:
        # Single whole-batch tile: lane-dense blocks equal the full array dims.
        tb = B
    else:
        # Multi-tile: tb must be a multiple of 128 (lane-dense output blocks +
        # bf16/int8 packing granules).  Cap at ~ceil(B/2) so there are always
        # >= 2 tiles and the "parallel" axis feeds both TensorCores on v7x
        # (harmless on single-TC v5e/v6e).
        # TODO(synk): if even 128 rows x C overflows the budget (huge C), add
        # class-axis tiling instead of relying on the raised vmem limit.
        max_tb = max((block_rows // _LANE) * _LANE, _LANE)
        half = (-(-B // 2) + _LANE - 1) // _LANE * _LANE
        tb = min(max_tb, half)

    num_tiles = pl.cdiv(B, tb)
    targets_lane = targets.astype(jnp.int32).reshape(1, B)

    kernel = functools.partial(_ce_per_row_kernel, total_rows=B, block_rows=tb)

    cost = pl.CostEstimate(
        flops=6 * B * C,
        transcendentals=B * C + B,
        bytes_accessed=B * C * itemsize + 2 * B * 4,
    )

    per_sample = pl.pallas_call(
        kernel,
        out_shape=jax.ShapeDtypeStruct((1, B), jnp.float32),
        grid=(num_tiles,),
        in_specs=[
            # Logits tile streamed in its native dtype (bf16 halves HBM traffic).
            # Only consider pipeline_mode=pl.Buffered(3) here if an xprof trace
            # shows the DMA exposed; deeper buffering costs VMEM (bad on v7x).
            pl.BlockSpec((tb, C), lambda i: (i, 0)),
            pl.BlockSpec((1, tb), lambda i: (0, i)),   # lane-dense targets tile
        ],
        out_specs=pl.BlockSpec((1, tb), lambda i: (0, i)),  # lane-dense loss tile
        compiler_params=pltpu.CompilerParams(
            # Batch tiles are independent -> shard across both TCs on v7x.
            dimension_semantics=("parallel",),
            vmem_limit_bytes=int(vmem_limit),
        ),
        cost_estimate=cost,
    )(logits, targets_lane)

    # Finish the mean + loss_weight scaling in the wrapper on the tiny (1, B)
    # result; keeps loss_weight out of the kernel (no captured constants).
    return (jnp.float32(loss_weight) * jnp.sum(per_sample)) / jnp.float32(B)


def _reference(logits, targets, loss_weight=1.0):
    # Pure-JAX reference (matches torch.nn.CrossEntropyLoss with default args).
    x = logits.astype(jnp.float32)
    lse = jax.nn.logsumexp(x, axis=-1)
    tgt = jnp.take_along_axis(x, targets[:, None].astype(jnp.int32), axis=-1)[:, 0]
    return loss_weight * jnp.mean(lse - tgt)


if __name__ == "__main__":
    key = jax.random.PRNGKey(0)
    k1, k2, k3, k4 = jax.random.split(key, 4)

    # Case 1: small f32 problem (single whole-batch tile), loss_weight = 1.
    B, C = 8, 32
    logits = jax.random.normal(k1, (B, C), dtype=jnp.float32)
    targets = jax.random.randint(k2, (B,), 0, C, dtype=jnp.int32)
    loss = cross_entropy_loss(logits, targets, loss_weight=1.0)
    jax.block_until_ready(loss)
    ref = _reference(logits, targets, loss_weight=1.0)
    assert jnp.allclose(loss, ref, atol=1e-5, rtol=1e-5), (loss, ref)

    # Case 2: bf16 logits, multiple lane-dense tiles (tb=256 -> 2 tiles, the
    # second one partial), loss_weight != 1.
    B2, C2 = 300, 160
    logits2 = (4.0 * jax.random.normal(k3, (B2, C2), dtype=jnp.float32)).astype(jnp.bfloat16)
    targets2 = jax.random.randint(k4, (B2,), 0, C2, dtype=jnp.int32)
    loss2 = cross_entropy_loss(logits2, targets2, loss_weight=0.5)
    jax.block_until_ready(loss2)
    ref2 = _reference(logits2, targets2, loss_weight=0.5)
    assert jnp.allclose(loss2, ref2, atol=1e-4, rtol=1e-4), (loss2, ref2)

    print("KERNEL_OK")
</pallas_src>

<mosaic_0001>
module attributes {stable_mosaic.version = 11 : i64} {
  func.func @_ce_per_row_kernel(%arg0: i32, %arg1: memref<8x32xf32, #tpu.memory_space<vmem>>, %arg2: memref<1x8xi32, #tpu.memory_space<vmem>>, %arg3: memref<1x8xf32, #tpu.memory_space<vmem>>) attributes {dimension_semantics = [#tpu.dimension_semantics<parallel>], iteration_bounds = array<i64: 1>, scalar_prefetch = 0 : i64, scratch_operands = 0 : i64, tpu.core_type = #tpu.core_type<tc>, window_params = [{transform_indices = @transform_0, window_bounds = array<i64: 8, 32>}, {transform_indices = @transform_1, window_bounds = array<i64: 1, 8>}, {transform_indices = @transform_2, window_bounds = array<i64: 1, 8>}]} {
    %c0 = arith.constant 0 : index
    %c0_0 = arith.constant 0 : index
    %0 = vector.load %arg1[%c0, %c0_0] : memref<8x32xf32, #tpu.memory_space<vmem>>, vector<8x32xf32>
    %cst = arith.constant dense<0xFF800000> : vector<8xf32>
    %1 = vector.multi_reduction <maximumf>, %0, %cst [1] : vector<8x32xf32> to vector<8xf32>
    %2 = vector.shape_cast %1 : vector<8xf32> to vector<8x1xf32>
    %3 = vector.broadcast %2 : vector<8x1xf32> to vector<8x32xf32>
    %4 = arith.subf %0, %3 : vector<8x32xf32>
    %5 = math.exp %4 : vector<8x32xf32>
    %cst_1 = arith.constant dense<0.000000e+00> : vector<8xf32>
    %6 = vector.multi_reduction <add>, %5, %cst_1 [1] : vector<8x32xf32> to vector<8xf32>
    %7 = vector.shape_cast %6 : vector<8xf32> to vector<8x1xf32>
    %c0_2 = arith.constant 0 : index
    %c0_3 = arith.constant 0 : index
    %8 = vector.load %arg2[%c0_2, %c0_3] : memref<1x8xi32, #tpu.memory_space<vmem>>, vector<1x8xi32>
    %9 = tpu.transpose %8, [1, 0] : vector<1x8xi32> -> vector<8x1xi32>
    %10 = tpu.iota {dimensions = array<i32: 1>} : vector<8x32xi32>
    %11 = vector.broadcast %9 : vector<8x1xi32> to vector<8x32xi32>
    %12 = arith.cmpi eq, %10, %11 : vector<8x32xi32>
    %cst_4 = arith.constant 0.000000e+00 : f32
    %13 = vector.broadcast %cst_4 : f32 to vector<8x32xf32>
    %14 = arith.select %12, %4, %13 : vector<8x32xi1>, vector<8x32xf32>
    %cst_5 = arith.constant dense<0.000000e+00> : vector<8xf32>
    %15 = vector.multi_reduction <add>, %14, %cst_5 [1] : vector<8x32xf32> to vector<8xf32>
    %16 = vector.shape_cast %15 : vector<8xf32> to vector<8x1xf32>
    %17 = math.log %7 : vector<8x1xf32>
    %18 = arith.subf %17, %16 : vector<8x1xf32>
    %c8_i32 = arith.constant 8 : i32
    %19 = arith.muli %arg0, %c8_i32 : i32
    %20 = tpu.iota {dimensions = array<i32: 0>} : vector<8x1xi32>
    %21 = vector.broadcast %19 : i32 to vector<8x1xi32>
    %22 = arith.addi %21, %20 : vector<8x1xi32>
    %c8_i32_6 = arith.constant 8 : i32
    %23 = vector.broadcast %c8_i32_6 : i32 to vector<8x1xi32>
    %24 = arith.cmpi slt, %22, %23 : vector<8x1xi32>
    %cst_7 = arith.constant 0.000000e+00 : f32
    %25 = vector.broadcast %cst_7 : f32 to vector<8x1xf32>
    %26 = arith.select %24, %18, %25 : vector<8x1xi1>, vector<8x1xf32>
    %27 = tpu.transpose %26, [1, 0] : vector<8x1xf32> -> vector<1x8xf32>
    %c0_8 = arith.constant 0 : index
    %c0_9 = arith.constant 0 : index
    %28 = vector.load %arg3[%c0_8, %c0_9] : memref<1x8xf32, #tpu.memory_space<vmem>>, vector<1x8xf32>
    tpu.vector_store %arg3[%c0_8, %c0_9], %27 {strides = array<i32>} : memref<1x8xf32, #tpu.memory_space<vmem>>, vector<1x8xf32>,
    return
  }
  func.func @transform_0(%arg0: i32) -> (i32, i32) {
    %c0_i32 = arith.constant 0 : i32
    %c0_i32_0 = arith.constant 0 : i32
    return %arg0, %c0_i32 : i32, i32
  }
  func.func @transform_1(%arg0: i32) -> (i32, i32) {
    %c0_i32 = arith.constant 0 : i32
    %c0_i32_0 = arith.constant 0 : i32
    return %c0_i32, %arg0 : i32, i32
  }
  func.func @transform_2(%arg0: i32) -> (i32, i32) {
    %c0_i32 = arith.constant 0 : i32
    %c0_i32_0 = arith.constant 0 : i32
    return %c0_i32, %arg0 : i32, i32
  }
}

</mosaic_0001>

<bundles_post_ra>
// kernel: tpu_custom_call.1
= control target key start
LH: loop header
LB: loop body
LE: loop exit
PB: predicated region body
PF: predicated region fallthrough
CT: control target
= control target key end

     0   :  { %7 = vsyncpa [#allocation3], 0  ;;  %s221_s0 = inlined_call_operand.hbm [shape: f32[8,32], index: 0, kind: input, shape index: {}]   ;;  %s222_s1 = inlined_call_operand.vmem [shape: s32[1,8], index: 1, kind: input, shape index: {}]   ;;  %s223_s2 = inlined_call_operand.hbm [shape: f32[1,8], index: 2, kind: output, shape index: {}]  }
   0x1   :  { %8 = vsyncpa [#allocation4], 0  ;;  %s191_s9 = smov [#allocation2]  }
   0x2   :  { %s15_s10 = sshll.u32 %s191_s9, 4  ;;  %s16_s10 = int_to_ptr.vmem [resolvable:$true] %s15_s10 }
   0x3   :  { %s155_s11 = scalar_lea.vmem %s16_s10, 128  ;;  %p160_p1 = scmp.lt.s32.totalorder %s16_s10, %s16_s10 }
   0x4   :  { %p156_p0 = scmp.ne.s32.totalorder %s16_s10, %s155_s11  ;;  %p161_p2 = scmp.lt.s32.totalorder %s155_s11, %s155_s11 }
   0x6   :  { %p162_p3 = por %p161_p2, %p160_p1 }
   0x8   :  { %p163_p4 = pnand %p162_p3, %p156_p0 }
   0xa   :  { %166 = shalt.err (!%p163_p4)
}
   0xb   :  { %18 = dma.hbm_to_vmem [thread:$0]  %s221_s0, 128, %s16_s10, [#allocation3]  }
   0xc   :  { %187 = dma.done.wait [#allocation3], 128  }
   0xd   :  { %188 = vsyncadd [#allocation3], 4294967168  ;;  %vm25_vm0 = vcmask 261120   ;;  %v24_v0 = vld [vmem:[#allocation2] sm:$0xff]  ;;  %v192_v2 = vmov 0   ;;  %v68_v10 = vlaneseq  ;;  %s193_s0 = smov [#allocation5]  }
   0xe   :  { %v26_v1 = vsel %vm25_vm0, %v24_v0, -inf  ;;  %141 = vset.pattern.permute.xlu1 %v192_v2  ;;  %v35_v3 = vld [vmem:[%s222_s1] sm:$0x1]  ;;  %s128_s1 = sshll.u32 %s193_s0, 4  ;;  %vm120_vm2 = vcmask 57344   ;;  %s129_s1 = int_to_ptr.vmem [resolvable:$true] %s128_s1 }
   0xf   :  { %27 = vmax.xlane.f32.xlu0 %v26_v1  ;;  %v69_v11 = vand.u32 127, %v68_v10  ;;  %s167_s16 = scalar_lea.vmem %s129_s1, 16  ;;  %s171_s17 = scalar_lea.vmem %s129_s1, 32 }
  0x10   :  { %p168_p5 = scmp.ne.s32.totalorder %s129_s1, %s167_s16  ;;  %p172_p6 = scmp.lt.s32.totalorder %s129_s1, %s129_s1 }
  0x11   :  { %p173_p7 = scmp.lt.s32.totalorder %s171_s17, %s167_s16 }
  0x13   :  { %p174_p8 = por %p173_p7, %p172_p6 }
  0x15   :  { %p175_p9 = pnand %p174_p8, %p168_p5 }
  0x3c   :  { %36 = vxpose.xlu0.b32.start.end [1/1] (short) (narrow) %v35_v3, 8 }
  0x65   :  { %142 = vset.pattern.permute.xlu0 %v192_v2 }
  0x98   :  { %v28_v4 = vpop.xlane.xlu0 %27 }
  0x99   :  { %v29_v6 = vsub.f32 %v24_v0, %v28_v4 }
  0x9b   :  { %v30_v7 = vmul.f32 1.442695, %v29_v6 }
  0x9d   :  { %143 = vpow2.f32 %v30_v7 }
  0xaa   :  { %v144_v8 = vpop.eup %143 }
  0xab   :  { %v32_v9 = vsel %vm25_vm0, %v144_v8, 0.0 }
  0xb8   :  { %v52_v5 = vpop.trf.xlu0 }
  0xb9   :  { %71 = vperm.xlu1 %141, %v52_v5  }
  0xdd   :  { %33 = vadd.xlane.f32.xlu1 %v32_v9 }
 0x134   :  { %v72_v12 = vpop.permute.xlu1 %71 }
 0x135   :  { %vm73_vm1 = vcmp.eq.s32.totalorder %v69_v11, %v72_v12 }
 0x136   :  { %v74_v13 = vsel %vm73_vm1, %v29_v6, 0.0 }
 0x137   :  { %v75_v14 = vsel %vm25_vm0, %v74_v13, 0.0 }
 0x138   :  { %76 = vadd.xlane.f32.xlu1 %v75_v14 }
 0x166   :  { %v34_v15 = vpop.xlane.xlu1 %33 }
 0x167   :  { %145 = vlog2.f32 %v34_v15 }
 0x174   :  { %v146_v16 = vpop.eup %145 }
 0x175   :  { %v79_v17 = vmul.f32 0.6931472, %v146_v16 }
 0x1c1   :  { %v77_v18 = vpop.xlane.xlu1 %76 }
 0x1c2   :  { %v80_v19 = vsub.f32 %v79_v17, %v77_v18 }
 0x1c4   :  { %88 = vxpose.xlu1.b32.start.end [1/1] (short) (narrow) %v80_v19, 8 }
 0x240   :  { %v104_v20 = vpop.trf.xlu1 }
 0x241   :  { %121 = vst.msk [vmem:[#allocation5] sm:$0x1] %vm120_vm2, %v104_v20 }
 0x242   :  { %178 = shalt.err (!%p175_p9)
}
 0x243   :  { %131 = dma.vmem_to_hbm [thread:$0]  %s129_s1, 16, %s223_s2, [#allocation4]  }
 0x244   :  { %189 = dma.done.wait [#allocation4], 16  }
 0x245   :  { %190 = vsyncadd [#allocation4], 4294967280 }
 0x246   :  { %135 = vsyncpa [#allocation3], 1 }
 0x247   :  { %136 = vsyncpa [#allocation4], 1 }

</bundles_post_ra>
